<compile_context>
chip_gen: v7x
topology: tpu7x:2x2x1
jax: 0.10.0
libtpu: 0.0.40
codegen_flags: <defaults>
</compile_context>

<pallas_src>
from functools import partial

import jax
import jax.numpy as jnp
from jax.experimental import pallas as pl
from jax.experimental.pallas import tpu as pltpu


def ou_kernel(x_ref, const_ref, w1_ref, b1_ref, w3_ref, bc_ref, o_ref):
    hid = w1_ref.shape[1] // 2

    # First SwiGLU layer: bf16 MXU matmul with f32 accumulation, then a single
    # VPU broadcast-add for the bias (replaces the old K=129 fused-bias trick).
    h12 = jnp.dot(const_ref[...].astype(jnp.bfloat16), w1_ref[...],
                  preferred_element_type=jnp.float32)            # [TB, 2*hid]
    h12 = h12 + b1_ref[...]                                      # + [1, 2*hid]

    h1 = h12[:, :hid]                                            # gate half
    h2 = h12[:, hid:]                                            # linear half

    # silu(h1) = h1 * sigmoid(h1); sigmoid via tanh (EUP slot, no VPU divide).
    sig = 0.5 * (jnp.tanh(0.5 * h1) + 1.0)
    act = (h1 * sig) * h2

    # Output projection (bf16 MXU, f32 accumulation) + b3 (row 0 of bc).
    y = jnp.dot(act.astype(jnp.bfloat16), w3_ref[...],
                preferred_element_type=jnp.float32) + bc_ref[0:1, :]

    # softplus with PyTorch-style threshold=20 for numerical stability.
    fac = jnp.where(y > 20.0, y, jnp.log1p(jnp.exp(jnp.minimum(y, 20.0))))

    # ou_const is row 1 of bc.
    o_ref[...] = (x_ref[...] - bc_ref[1:2, :]) * fac


@partial(jax.jit, static_argnames=("block_b",))
def ou_forward(x, t, cond, packed, block_b=1024):
    """x: [B, x_dim], t: [B, time_dim], cond: [B, cond_dim].

    `packed` holds kernel-ready parameters from pack_params() (bf16 W1/W3 with
    hidden width padded to a multiple of 128, f32 b1, merged [2, x_dim] b3/ou_const).
    """
    B, x_dim = x.shape
    const = jnp.concatenate([t, cond], axis=-1)                  # [B, d_in]
    d_in = const.shape[-1]
    two_hid = packed["w1"].shape[-1]
    hid_pad = packed["w3"].shape[0]

    tb = B if B <= block_b else block_b                          # batch tile
    grid = (pl.cdiv(B, tb),)

    out = pl.pallas_call(
        ou_kernel,
        out_shape=jax.ShapeDtypeStruct((B, x_dim), jnp.float32),
        grid=grid,
        in_specs=[
            pl.BlockSpec((tb, x_dim), lambda i: (i, 0)),         # x (B-tiled)
            pl.BlockSpec((tb, d_in), lambda i: (i, 0)),          # const (B-tiled)
            pl.BlockSpec((d_in, two_hid), lambda i: (0, 0)),     # W1 (resident)
            pl.BlockSpec((1, two_hid), lambda i: (0, 0)),        # b1 (resident)
            pl.BlockSpec((hid_pad, x_dim), lambda i: (0, 0)),    # W3 (resident)
            pl.BlockSpec((2, x_dim), lambda i: (0, 0)),          # [b3; ou_const]
        ],
        out_specs=pl.BlockSpec((tb, x_dim), lambda i: (i, 0)),
        compiler_params=pltpu.CompilerParams(
            dimension_semantics=("parallel",)),                  # megacore on v7x
    )(x, const, packed["w1"], packed["b1"], packed["w3"], packed["bc"])

    return out


def init_params(key, x_dim, time_dim, cond_dim):
    """Natural (PyTorch-layout) parameters, synthetic deterministic init."""
    d_in = time_dim + cond_dim
    hid = d_in  # SwiGLUNet hidden width = input width
    ks = jax.random.split(key, 7)
    lim1 = 1.0 / jnp.sqrt(d_in)
    lim3 = 1.0 / jnp.sqrt(hid)
    u = lambda k, shp, lim: jax.random.uniform(k, shp, jnp.float32, -lim, lim)
    return {
        "w1a": u(ks[0], (d_in, hid), lim1),
        "b1a": u(ks[1], (hid,), lim1),
        "w1b": u(ks[2], (d_in, hid), lim1),
        "b1b": u(ks[3], (hid,), lim1),
        "w3":  u(ks[4], (hid, x_dim), lim3),
        "b3":  u(ks[5], (x_dim,), lim3),
        "ou_const": jax.random.normal(ks[6], (x_dim,), jnp.float32),
    }


def pack_params(p):
    """Pack natural params into the kernel-ready layout.

    - hidden width zero-padded to a multiple of 128 (gate/value split stays on
      a lane-tile boundary; padded hidden units contribute exactly zero),
    - W1 / W3 stored in bf16 (MXU-native), b1 kept in f32,
    - b3 and ou_const merged into one [2, x_dim] array.
    """
    hid, x_dim = p["w3"].shape
    hid_pad = ((hid + 127) // 128) * 128
    hp = hid_pad - hid
    pad_cols = (lambda a: jnp.pad(a, ((0, 0), (0, hp)))) if hp else (lambda a: a)
    pad_vec = (lambda a: jnp.pad(a, ((0, hp),))) if hp else (lambda a: a)
    pad_rows = (lambda a: jnp.pad(a, ((0, hp), (0, 0)))) if hp else (lambda a: a)

    w1 = jnp.concatenate([pad_cols(p["w1a"]), pad_cols(p["w1b"])],
                         axis=1).astype(jnp.bfloat16)            # [d_in, 2*hid_pad]
    b1 = jnp.concatenate([pad_vec(p["b1a"]), pad_vec(p["b1b"])]
                         )[None, :].astype(jnp.float32)          # [1, 2*hid_pad]
    w3 = pad_rows(p["w3"]).astype(jnp.bfloat16)                  # [hid_pad, x_dim]
    bc = jnp.stack([p["b3"], p["ou_const"]], axis=0).astype(jnp.float32)  # [2, x_dim]

    return {"w1": w1, "b1": b1, "w3": w3, "bc": bc}


def ou_reference_f32(x, t, cond, p):
    """Full-f32 reference (module semantics)."""
    const = jnp.concatenate([t, cond], axis=-1)
    h1 = const @ p["w1a"] + p["b1a"]
    h2 = const @ p["w1b"] + p["b1b"]
    y = (jax.nn.silu(h1) * h2) @ p["w3"] + p["b3"]
    return (x - p["ou_const"][None, :]) * jax.nn.softplus(y)


def ou_reference_matched(x, t, cond, packed):
    """Pure-JAX reference with the same bf16-matmul / f32-accumulation scheme."""
    const = jnp.concatenate([t, cond], axis=-1)
    hid = packed["w1"].shape[1] // 2
    h12 = jnp.dot(const.astype(jnp.bfloat16), packed["w1"],
                  preferred_element_type=jnp.float32) + packed["b1"]
    h1, h2 = h12[:, :hid], h12[:, hid:]
    y = jnp.dot((jax.nn.silu(h1) * h2).astype(jnp.bfloat16), packed["w3"],
                preferred_element_type=jnp.float32) + packed["bc"][0:1]
    return (x - packed["bc"][1:2]) * jax.nn.softplus(y)


if __name__ == "__main__":
    # Module-default feature dims (x_dim=256, cond_dim=64, time_dim=64), small batch.
    B, x_dim, time_dim, cond_dim = 8, 256, 64, 64

    key = jax.random.PRNGKey(0)
    kx, kt, kc, kp = jax.random.split(key, 4)
    x = jax.random.normal(kx, (B, x_dim), jnp.float32)
    t = jax.random.normal(kt, (B, time_dim), jnp.float32)
    cond = jax.random.normal(kc, (B, cond_dim), jnp.float32)

    params = init_params(kp, x_dim, time_dim, cond_dim)
    packed = pack_params(params)

    out = jax.block_until_ready(ou_forward(x, t, cond, packed))
    assert out.shape == (B, x_dim)

    # Tight check against a precision-matched JAX reference (verifies the kernel).
    ref_m = ou_reference_matched(x, t, cond, packed)
    assert jnp.allclose(out, ref_m, atol=2e-4, rtol=2e-4), "mismatch vs matched ref"

    # Loose check against the full-f32 module semantics (bf16 matmul inputs).
    ref_f = ou_reference_f32(x, t, cond, params)
    assert jnp.allclose(out, ref_f, atol=5e-2, rtol=5e-2), "mismatch vs f32 ref"

    print("KERNEL_OK")
</pallas_src>

<mosaic_0001>
module attributes {stable_mosaic.version = 11 : i64} {
  func.func @ou_kernel(%arg0: i32, %arg1: memref<8x256xf32, #tpu.memory_space<vmem>>, %arg2: memref<8x128xf32, #tpu.memory_space<vmem>>, %arg3: memref<128x256xbf16, #tpu.memory_space<vmem>>, %arg4: memref<1x256xf32, #tpu.memory_space<vmem>>, %arg5: memref<128x256xbf16, #tpu.memory_space<vmem>>, %arg6: memref<2x256xf32, #tpu.memory_space<vmem>>, %arg7: memref<8x256xf32, #tpu.memory_space<vmem>>) attributes {dimension_semantics = [#tpu.dimension_semantics<parallel>], iteration_bounds = array<i64: 1>, scalar_prefetch = 0 : i64, scratch_operands = 0 : i64, tpu.core_type = #tpu.core_type<tc>, window_params = [{transform_indices = @transform_0, window_bounds = array<i64: 8, 256>}, {transform_indices = @transform_1, window_bounds = array<i64: 8, 128>}, {pipeline_mode = #tpu.pipeline_mode<synchronous>, transform_indices = @transform_2, window_bounds = array<i64: 128, 256>}, {pipeline_mode = #tpu.pipeline_mode<synchronous>, transform_indices = @transform_3, window_bounds = array<i64: 1, 256>}, {pipeline_mode = #tpu.pipeline_mode<synchronous>, transform_indices = @transform_4, window_bounds = array<i64: 128, 256>}, {pipeline_mode = #tpu.pipeline_mode<synchronous>, transform_indices = @transform_5, window_bounds = array<i64: 2, 256>}, {transform_indices = @transform_6, window_bounds = array<i64: 8, 256>}]} {
    %c0 = arith.constant 0 : index
    %c0_0 = arith.constant 0 : index
    %0 = vector.load %arg2[%c0, %c0_0] : memref<8x128xf32, #tpu.memory_space<vmem>>, vector<8x128xf32>
    %1 = arith.truncf %0 : vector<8x128xf32> to vector<8x128xbf16>
    %c0_1 = arith.constant 0 : index
    %c0_2 = arith.constant 0 : index
    %2 = vector.load %arg3[%c0_1, %c0_2] : memref<128x256xbf16, #tpu.memory_space<vmem>>, vector<128x256xbf16>
    %cst = arith.constant dense<0.000000e+00> : vector<8x256xf32>
    %3 = tpu.matmul %1, %2, %cst {dimension_numbers = #tpu.dot_dimension_numbers<[1], [0], [0], [1], [0, 0, 1, 1], [], []>} : vector<8x128xbf16>, vector<128x256xbf16>, vector<8x256xf32> -> vector<8x256xf32>
    %c0_3 = arith.constant 0 : index
    %c0_4 = arith.constant 0 : index
    %4 = vector.load %arg4[%c0_3, %c0_4] : memref<1x256xf32, #tpu.memory_space<vmem>>, vector<1x256xf32>
    %5 = vector.broadcast %4 : vector<1x256xf32> to vector<8x256xf32>
    %6 = arith.addf %3, %5 : vector<8x256xf32>
    %7 = vector.extract_strided_slice %6 {offsets = [0, 0], sizes = [8, 128], strides = [1, 1]} : vector<8x256xf32> to vector<8x128xf32>
    %8 = vector.extract_strided_slice %6 {offsets = [0, 128], sizes = [8, 128], strides = [1, 1]} : vector<8x256xf32> to vector<8x128xf32>
    %cst_5 = arith.constant 5.000000e-01 : f32
    %9 = vector.broadcast %cst_5 : f32 to vector<8x128xf32>
    %10 = arith.mulf %9, %7 : vector<8x128xf32>
    %11 = math.tanh %10 : vector<8x128xf32>
    %cst_6 = arith.constant 1.000000e+00 : f32
    %12 = vector.broadcast %cst_6 : f32 to vector<8x128xf32>
    %13 = arith.addf %11, %12 : vector<8x128xf32>
    %cst_7 = arith.constant 5.000000e-01 : f32
    %14 = vector.broadcast %cst_7 : f32 to vector<8x128xf32>
    %15 = arith.mulf %14, %13 : vector<8x128xf32>
    %16 = arith.mulf %7, %15 : vector<8x128xf32>
    %17 = arith.mulf %16, %8 : vector<8x128xf32>
    %18 = arith.truncf %17 : vector<8x128xf32> to vector<8x128xbf16>
    %c0_8 = arith.constant 0 : index
    %c0_9 = arith.constant 0 : index
    %19 = vector.load %arg5[%c0_8, %c0_9] : memref<128x256xbf16, #tpu.memory_space<vmem>>, vector<128x256xbf16>
    %cst_10 = arith.constant dense<0.000000e+00> : vector<8x256xf32>
    %20 = tpu.matmul %18, %19, %cst_10 {dimension_numbers = #tpu.dot_dimension_numbers<[1], [0], [0], [1], [0, 0, 1, 1], [], []>} : vector<8x128xbf16>, vector<128x256xbf16>, vector<8x256xf32> -> vector<8x256xf32>
    %c0_11 = arith.constant 0 : index
    %c0_12 = arith.constant 0 : index
    %21 = vector.load %arg6[%c0_11, %c0_12] : memref<2x256xf32, #tpu.memory_space<vmem>>, vector<1x256xf32>
    %22 = vector.broadcast %21 : vector<1x256xf32> to vector<8x256xf32>
    %23 = arith.addf %20, %22 : vector<8x256xf32>
    %cst_13 = arith.constant 2.000000e+01 : f32
    %24 = vector.broadcast %cst_13 : f32 to vector<8x256xf32>
    %25 = arith.cmpf ogt, %23, %24 : vector<8x256xf32>
    %cst_14 = arith.constant 2.000000e+01 : f32
    %26 = vector.broadcast %cst_14 : f32 to vector<8x256xf32>
    %27 = arith.minimumf %23, %26 : vector<8x256xf32>
    %28 = math.exp %27 : vector<8x256xf32>
    %29 = math.log1p %28 : vector<8x256xf32>
    %30 = arith.select %25, %23, %29 : vector<8x256xi1>, vector<8x256xf32>
    %c0_15 = arith.constant 0 : index
    %c0_16 = arith.constant 0 : index
    %31 = vector.load %arg1[%c0_15, %c0_16] : memref<8x256xf32, #tpu.memory_space<vmem>>, vector<8x256xf32>
    %c1 = arith.constant 1 : index
    %c0_17 = arith.constant 0 : index
    %32 = vector.load %arg6[%c1, %c0_17] : memref<2x256xf32, #tpu.memory_space<vmem>>, vector<1x256xf32>
    %33 = vector.broadcast %32 : vector<1x256xf32> to vector<8x256xf32>
    %34 = arith.subf %31, %33 : vector<8x256xf32>
    %35 = arith.mulf %34, %30 : vector<8x256xf32>
    %c0_18 = arith.constant 0 : index
    %c0_19 = arith.constant 0 : index
    %36 = vector.load %arg7[%c0_18, %c0_19] : memref<8x256xf32, #tpu.memory_space<vmem>>, vector<8x256xf32>
    tpu.vector_store %arg7[%c0_18, %c0_19], %35 {strides = array<i32>} : memref<8x256xf32, #tpu.memory_space<vmem>>, vector<8x256xf32>,
    return
  }
  func.func @transform_0(%arg0: i32) -> (i32, i32) {
    %c0_i32 = arith.constant 0 : i32
    %c0_i32_0 = arith.constant 0 : i32
    return %arg0, %c0_i32 : i32, i32
  }
  func.func @transform_1(%arg0: i32) -> (i32, i32) {
    %c0_i32 = arith.constant 0 : i32
    %c0_i32_0 = arith.constant 0 : i32
    return %arg0, %c0_i32 : i32, i32
  }
  func.func @transform_2(%arg0: i32) -> (i32, i32) {
    %c0_i32 = arith.constant 0 : i32
    %c0_i32_0 = arith.constant 0 : i32
    %c0_i32_1 = arith.constant 0 : i32
    return %c0_i32, %c0_i32_0 : i32, i32
  }
  func.func @transform_3(%arg0: i32) -> (i32, i32) {
    %c0_i32 = arith.constant 0 : i32
    %c0_i32_0 = arith.constant 0 : i32
    %c0_i32_1 = arith.constant 0 : i32
    return %c0_i32, %c0_i32_0 : i32, i32
  }
  func.func @transform_4(%arg0: i32) -> (i32, i32) {
    %c0_i32 = arith.constant 0 : i32
    %c0_i32_0 = arith.constant 0 : i32
    %c0_i32_1 = arith.constant 0 : i32
    return %c0_i32, %c0_i32_0 : i32, i32
  }
  func.func @transform_5(%arg0: i32) -> (i32, i32) {
    %c0_i32 = arith.constant 0 : i32
    %c0_i32_0 = arith.constant 0 : i32
    %c0_i32_1 = arith.constant 0 : i32
    return %c0_i32, %c0_i32_0 : i32, i32
  }
  func.func @transform_6(%arg0: i32) -> (i32, i32) {
    %c0_i32 = arith.constant 0 : i32
    %c0_i32_0 = arith.constant 0 : i32
    return %arg0, %c0_i32 : i32, i32
  }
}

</mosaic_0001>

<bundles_post_ra>
// kernel: ou_forward.1
= control target key start
LH: loop header
LB: loop body
LE: loop exit
PB: predicated region body
PF: predicated region fallthrough
CT: control target
= control target key end

     0   :  { %11 = vsyncpa [#allocation3], 0  ;;  %s689_s0 = inlined_call_operand.vmem [shape: f32[8,256], index: 0, kind: input, shape index: {}]   ;;  %s690_s1 = inlined_call_operand.vmem [shape: f32[8,128], index: 1, kind: input, shape index: {}]   ;;  %s691_s2 = inlined_call_operand.hbm [shape: bf16[128,256], index: 2, kind: input, shape index: {}]   ;;  %s692_s3 = inlined_call_operand.vmem [shape: f32[1,256], index: 3, kind: input, shape index: {}]   ;;  %s693_s4 = inlined_call_operand.hbm [shape: bf16[128,256], index: 4, kind: input, shape index: {}]   ;;  %s694_s5 = inlined_call_operand.vmem [shape: f32[2,256], index: 5, kind: input, shape index: {}]   ;;  %s695_s6 = inlined_call_operand.hbm [shape: f32[8,256], index: 6, kind: output, shape index: {}]  }
   0x1   :  { %12 = vsyncpa [#allocation6], 0 }
   0x2   :  { %13 = vsyncpa [#allocation4], 0  ;;  %s594_s21 = smov [#allocation2]   ;;  %s522_s25 = scalar_lea.hbm %s691_s2, 2048 }
   0x3   :  { %s23_s22 = sshll.u32 %s594_s21, 4  ;;  %p523_p0 = scmp.ne.s32.totalorder %s691_s2, %s522_s25  ;;  %s24_s22 = int_to_ptr.vmem [resolvable:$true] %s23_s22 }
   0x4   :  { %p526_p1 = scmp.lt.u32.totalorder %s522_s25, %s691_s2 }
   0x6   :  { %p528_p2 = pnand %p526_p1, %p523_p0 }
   0x8   :  { %531 = shalt.err (!%p528_p2)
}
   0x9   :  { %s532_s30 = scalar_lea.vmem %s24_s22, 2048  ;;  %p537_p4 = scmp.lt.s32.totalorder %s24_s22, %s24_s22 }
   0xa   :  { %p533_p3 = scmp.ne.s32.totalorder %s24_s22, %s532_s30  ;;  %p538_p5 = scmp.lt.s32.totalorder %s532_s30, %s532_s30 }
   0xc   :  { %p539_p6 = por %p538_p5, %p537_p4 }
   0xe   :  { %p540_p7 = pnand %p539_p6, %p533_p3 }
  0x10   :  { %543 = shalt.err (!%p540_p7)
}
  0x11   :  { %s595_s7 = smov 128   ;;  %s596_s8 = smov 8  }
  0x12   :  { %29 = dma.hbm_to_vmem [thread:$0]  %s691_s2, 2048, %s24_s22, [#allocation3], %s595_s7, %s595_s7, %s596_s8  }
  0x13   :  { %s597_s11 = smov [#allocation5]   ;;  %s544_s15 = scalar_lea.hbm %s693_s4, 2048 }
  0x14   :  { %s37_s12 = sshll.u32 %s597_s11, 4  ;;  %p545_p8 = scmp.ne.s32.totalorder %s693_s4, %s544_s15  ;;  %s38_s12 = int_to_ptr.vmem [resolvable:$true] %s37_s12 }
  0x15   :  { %p548_p9 = scmp.lt.u32.totalorder %s544_s15, %s693_s4 }
  0x17   :  { %p550_p10 = pnand %p548_p9, %p545_p8 }
  0x19   :  { %553 = shalt.err (!%p550_p10)
}
  0x1a   :  { %s554_s20 = scalar_lea.vmem %s38_s12, 2048  ;;  %p559_p12 = scmp.lt.s32.totalorder %s38_s12, %s38_s12 }
  0x1b   :  { %p555_p11 = scmp.ne.s32.totalorder %s38_s12, %s554_s20  ;;  %p560_p13 = scmp.lt.s32.totalorder %s554_s20, %s554_s20 }
  0x1d   :  { %p561_p0 = por %p560_p13, %p559_p12 }
  0x1f   :  { %p562_p1 = pnand %p561_p0, %p555_p11 }
  0x21   :  { %565 = shalt.err (!%p562_p1)
}
  0x22   :  { %43 = dma.hbm_to_vmem [thread:$0]  %s693_s4, 2048, %s38_s12, [#allocation6], %s595_s7, %s595_s7, %s596_s8  }
  0x23   :  { %588 = dma.done.wait [#allocation3], 2048  }
  0x24   :  { %589 = vsyncadd [#allocation3], 4294965248 }
  0x25   :  { %590 = dma.done.wait [#allocation6], 2048  }
  0x26   :  { %591 = vsyncadd [#allocation6], 4294965248  ;;  %v598_v0 = vmov 0   ;;  %v464_v1 = vld [vmem:[#allocation2 + $0x4] ss:$8 sps:$4 sm:$0xff]   ;;  %v73_v35 = vlaneseq }
  0x27   :  { %195 = vmatprep.mubr.bf16.mxu0 %v598_v0  ;;  %351 = vmatprep.mubr.bf16.mxu1 %v598_v0  ;;  %v466_v2 = vld [vmem:[#allocation2] ss:$8 sps:$4 sm:$0xff]   ;;  %v467_v3 = vld [vmem:[#allocation2 + $0x14] ss:$8 sps:$4 sm:$0xff]   ;;  %v469_v4 = vld [vmem:[#allocation2 + $0x10] ss:$8 sps:$4 sm:$0xff]  }
  0x28   :  { %163 = vmatprep.subr.bf16.mxu0 %v464_v1  ;;  %v470_v5 = vld [vmem:[#allocation2 + $0x24] ss:$8 sps:$4 sm:$0xff]   ;;  %v472_v6 = vld [vmem:[#allocation2 + $0x20] ss:$8 sps:$4 sm:$0xff]   ;;  %v473_v7 = vld [vmem:[#allocation2 + $0x34] ss:$8 sps:$4 sm:$0xff]  }
  0x29   :  { %164 = vmatpush1.bf16.msra.mxu0 %v466_v2  ;;  %v475_v8 = vld [vmem:[#allocation2 + $0x30] ss:$8 sps:$4 sm:$0xff]   ;;  %v476_v9 = vld [vmem:[#allocation2 + $0x44] ss:$8 sps:$4 sm:$0xff]   ;;  %v490_v11 = vld [vmem:[#allocation5] ss:$8 sps:$4 sm:$0xff]  }
  0x2a   :  { %165 = vmatprep.subr.bf16.mxu0 %v467_v3  ;;  %v488_v10 = vld [vmem:[#allocation5 + $0x4] ss:$8 sps:$4 sm:$0xff]   ;;  %v478_v12 = vld [vmem:[#allocation2 + $0x40] ss:$8 sps:$4 sm:$0xff]   ;;  %v491_v13 = vld [vmem:[#allocation5 + $0x14] ss:$8 sps:$4 sm:$0xff]  }
  0x2b   :  { %319 = vmatprep.subr.bf16.mxu1 %v488_v10  ;;  %v493_v14 = vld [vmem:[#allocation5 + $0x10] ss:$8 sps:$4 sm:$0xff]   ;;  %v479_v15 = vld [vmem:[#allocation2 + $0x54] ss:$8 sps:$4 sm:$0xff]   ;;  %v482_v17 = vld [vmem:[#allocation2 + $0x64] ss:$8 sps:$4 sm:$0xff]  }
  0x2c   :  { %320 = vmatpush1.bf16.msra.mxu1 %v490_v11  ;;  %v481_v16 = vld [vmem:[#allocation2 + $0x50] ss:$8 sps:$4 sm:$0xff]   ;;  %v484_v18 = vld [vmem:[#allocation2 + $0x60] ss:$8 sps:$4 sm:$0xff]   ;;  %v485_v19 = vld [vmem:[#allocation2 + $0x74] ss:$8 sps:$4 sm:$0xff]  }
  0x2d   :  { %166 = vmatpush1.bf16.msra.mxu0 %v469_v4  ;;  %321 = vmatprep.subr.bf16.mxu1 %v491_v13  ;;  %v487_v20 = vld [vmem:[#allocation2 + $0x70] ss:$8 sps:$4 sm:$0xff]   ;;  %v53_v21 = vld [vmem:[%s690_s1] sm:$0xff]  ;;  %v497_v25 = vld [vmem:[#allocation5 + $0x34] ss:$8 sps:$4 sm:$0xff]   ;;  %v74_v36 = vshrl.u32 %v73_v35, 7 }
  0x2e   :  { %167 = vmatprep.subr.bf16.mxu0 %v470_v5  ;;  %v54_v22 = vpack.c.bf16 %v53_v21, %v53_v21  ;;  %v494_v23 = vld [vmem:[#allocation5 + $0x24] ss:$8 sps:$4 sm:$0xff]   ;;  %v496_v24 = vld [vmem:[#allocation5 + $0x20] ss:$8 sps:$4 sm:$0xff]   ;;  %v499_v26 = vld [vmem:[#allocation5 + $0x30] ss:$8 sps:$4 sm:$0xff]  }
  0x2f   :  { %v500_v27 = vld [vmem:[#allocation5 + $0x44] ss:$8 sps:$4 sm:$0xff]   ;;  %v502_v28 = vld [vmem:[#allocation5 + $0x40] ss:$8 sps:$4 sm:$0xff]   ;;  %v503_v29 = vld [vmem:[#allocation5 + $0x54] ss:$8 sps:$4 sm:$0xff]  }
  0x30   :  { %322 = vmatpush1.bf16.msra.mxu1 %v493_v14  ;;  %v505_v30 = vld [vmem:[#allocation5 + $0x50] ss:$8 sps:$4 sm:$0xff]   ;;  %v506_v31 = vld [vmem:[#allocation5 + $0x64] ss:$8 sps:$4 sm:$0xff]   ;;  %v508_v32 = vld [vmem:[#allocation5 + $0x60] ss:$8 sps:$4 sm:$0xff]  }
  0x31   :  { %168 = vmatpush1.bf16.msra.mxu0 %v472_v6  ;;  %323 = vmatprep.subr.bf16.mxu1 %v494_v23  ;;  %v509_v33 = vld [vmem:[#allocation5 + $0x74] ss:$8 sps:$4 sm:$0xff]   ;;  %v511_v34 = vld [vmem:[#allocation5 + $0x70] ss:$8 sps:$4 sm:$0xff]   ;;  %v75_v37 = vsub.s32 0, %v74_v36  ;;  %v79_v46 = vsub.s32 1, %v74_v36 }
  0x32   :  { %169 = vmatprep.subr.bf16.mxu0 %v473_v7  ;;  %v71_v38 = vld [vmem:[%s692_s3] sm:$0x3] }
  0x33   :  { %v76_v39 = vrot.slane %v71_v38, %v75_v37  ;;  %v80_v49 = vrot.slane %v71_v38, %v79_v46  ;;  %v227_v55 = vld [vmem:[%s694_s5] ss:$2 sm:$0x3]  ;;  %v457_v10 = vld [vmem:[%s694_s5 + $0x1] ss:$2 sm:$0x3] }
  0x34   :  { %324 = vmatpush1.bf16.msra.mxu1 %v496_v24  ;;  %v232_v56 = vrot.slane %v227_v55, %v75_v37  ;;  %v236_v57 = vrot.slane %v227_v55, %v79_v46  ;;  %s599_s5 = smov [#allocation7]  }
  0x35   :  { %170 = vmatpush1.bf16.msra.mxu0 %v475_v8  ;;  %325 = vmatprep.subr.bf16.mxu1 %v497_v25  ;;  %s415_s7 = sshll.u32 %s599_s5, 4  ;;  %s416_s7 = int_to_ptr.vmem [resolvable:$true] %s415_s7 }
  0x36   :  { %171 = vmatprep.subr.bf16.mxu0 %v476_v9  ;;  %p571_p3 = scmp.lt.s32.totalorder %s416_s7, %s416_s7 }
  0x38   :  { %326 = vmatpush1.bf16.msra.mxu1 %v499_v26 }
  0x39   :  { %172 = vmatpush1.bf16.msra.mxu0 %v478_v12  ;;  %327 = vmatprep.subr.bf16.mxu1 %v500_v27  ;;  %v396_v12 = vrot.slane %v457_v10, %v75_v37 }
  0x3a   :  { %173 = vmatprep.subr.bf16.mxu0 %v479_v15  ;;  %v388_v15 = vld [vmem:[%s689_s0] sm:$0xff] }
  0x3b   :  { %v403_v23 = vsub.f32 %v388_v15, %v396_v12 }
  0x3c   :  { %328 = vmatpush1.bf16.msra.mxu1 %v502_v28 }
  0x3d   :  { %174 = vmatpush1.bf16.msra.mxu0 %v481_v16  ;;  %329 = vmatprep.subr.bf16.mxu1 %v503_v29  ;;  %v400_v16 = vrot.slane %v457_v10, %v79_v46 }
  0x3e   :  { %175 = vmatprep.subr.bf16.mxu0 %v482_v17 }
  0x40   :  { %330 = vmatpush1.bf16.msra.mxu1 %v505_v30 }
  0x41   :  { %176 = vmatpush1.bf16.msra.mxu0 %v484_v18  ;;  %331 = vmatprep.subr.bf16.mxu1 %v506_v31  ;;  %v389_v18 = vld [vmem:[%s689_s0 + $0x8] sm:$0xff]  ;;  %s566_s0 = scalar_lea.vmem %s416_s7, 256 }
  0x42   :  { %177 = vmatprep.subr.bf16.mxu0 %v485_v19  ;;  %v404_v26 = vsub.f32 %v389_v18, %v400_v16  ;;  %p567_p2 = scmp.ne.s32.totalorder %s416_s7, %s566_s0  ;;  %p572_p4 = scmp.lt.s32.totalorder %s566_s0, %s566_s0 }
  0x44   :  { %332 = vmatpush1.bf16.msra.mxu1 %v508_v32  ;;  %p573_p5 = por %p572_p4, %p571_p3 }
  0x45   :  { %178 = vmatpush1.bf16.msra.mxu0 %v487_v20  ;;  %333 = vmatprep.subr.bf16.mxu1 %v509_v33 }
  0x46   :  { %p574_p6 = pnand %p573_p5, %p567_p2 }
  0x48   :  { %196 = vmatmul.mubr.bf16.vlgmr.msra.gmra.mrb[0].mxu0 %v54_v22  ;;  %334 = vmatpush1.bf16.msra.mxu1 %v511_v34 }
 0x11b   :  { %v197_v40 = vpop.f32.mrb[0].mxu0 }
 0x11c   :  { %v198_v41 = vadd.f32 %v197_v40, %v76_v39  ;;  %v199_v42 = vpop.f32.mrb[1].mxu0 }
 0x11d   :  { %v201_v43 = vpop.f32.mrb[2].mxu0  ;;  %v200_v52 = vadd.f32 %v199_v42, %v80_v49 }
 0x11e   :  { %v204_v44 = vmul.f32 0.5, %v198_v41  ;;  %v202_v45 = vpop.f32.mrb[3].mxu0 }
 0x120   :  { %512 = vtanh.f32 %v204_v44 }
 0x12a   :  { %v513_v47 = vpop.eup %512 }
 0x12b   :  { %v206_v48 = vadd.f32 1.0, %v513_v47 }
 0x12d   :  { %v207_v50 = vmul.f32 0.5, %v206_v48 }
 0x12f   :  { %v208_v51 = vmul.f32 %v207_v50, %v198_v41 }
 0x131   :  { %v209_v53 = vmul.f32 %v208_v51, %v200_v52 }
 0x133   :  { %v210_v54 = vpack.c.bf16 %v209_v53, %v209_v53 }
 0x135   :  { %352 = vmatmul.mubr.bf16.vlgmr.msra.gmra.mrb[0].mxu1 %v210_v54 }
 0x208   :  { %v353_v58 = vpop.f32.mrb[0].mxu1 }
 0x209   :  { %v354_v59 = vadd.f32 %v353_v58, %v232_v56  ;;  %v355_v60 = vpop.f32.mrb[1].mxu1 }
 0x20a   :  { %v356_v61 = vadd.f32 %v355_v60, %v236_v57  ;;  %v357_v62 = vpop.f32.mrb[2].mxu1 }
 0x20b   :  { %v362_v63 = vmin.f32 %v354_v59, 20.0  ;;  %v358_v0 = vpop.f32.mrb[3].mxu1  ;;  %vm360_vm1 = vcmp.gt.f32.partialorder %v354_v59, 20.0 }
 0x20c   :  { %v363_v1 = vmin.f32 %v356_v61, 20.0  ;;  %vm361_vm3 = vcmp.gt.f32.partialorder %v356_v61, 20.0 }
 0x20d   :  { %v364_v2 = vmul.f32 1.442695, %v362_v63 }
 0x20e   :  { %v366_v3 = vmul.f32 1.442695, %v363_v1 }
 0x20f   :  { %514 = vpow2.f32 %v364_v2 }
 0x210   :  { %516 = vpow2.f32 %v366_v3 }
 0x219   :  { %v515_v4 = vpop.eup %514 }
 0x21a   :  { %v517_v5 = vpop.eup %516  ;;  %v368_v6 = vadd.f32 1.0, %v515_v4  ;;  %v371_v8 = vmul.f32 -0.5, %v515_v4  ;;  %v374_v13 = vand.u32 2147483647, %v515_v4 }
 0x21b   :  { %v377_v7 = vadd.f32 1.0, %v517_v5  ;;  %v380_v9 = vmul.f32 -0.5, %v517_v5  ;;  %v383_v17 = vand.u32 2147483647, %v517_v5 }
 0x21c   :  { %518 = vlog2.f32 %v368_v6  ;;  %v372_v11 = vadd.f32 1.0, %v371_v8  ;;  %vm375_vm0 = vcmp.lt.f32.partialorder %v374_v13, 0.0004427343 }
 0x21d   :  { %520 = vlog2.f32 %v377_v7  ;;  %v381_v14 = vadd.f32 1.0, %v380_v9  ;;  %vm384_vm2 = vcmp.lt.f32.partialorder %v383_v17, 0.0004427343 }
 0x21e   :  { %v373_v22 = vmul.f32 %v515_v4, %v372_v11 }
 0x21f   :  { %v382_v25 = vmul.f32 %v517_v5, %v381_v14 }
 0x226   :  { %v519_v19 = vpop.eup %518 }
 0x227   :  { %v521_v20 = vpop.eup %520  ;;  %v370_v21 = vmul.f32 0.6931472, %v519_v19 }
 0x228   :  { %v379_v24 = vmul.f32 0.6931472, %v521_v20 }
 0x229   :  { %v376_v27 = vsel %vm375_vm0, %v373_v22, %v370_v21 }
 0x22a   :  { %v386_v28 = vsel %vm360_vm1, %v354_v59, %v376_v27  ;;  %v385_v29 = vsel %vm384_vm2, %v382_v25, %v379_v24 }
 0x22b   :  { %v387_v30 = vsel %vm361_vm3, %v356_v61, %v385_v29  ;;  %v405_v31 = vmul.f32 %v403_v23, %v386_v28 }
 0x22c   :  { %v406_v32 = vmul.f32 %v404_v26, %v387_v30 }
 0x22d   :  { %407 = vst [vmem:[#allocation7] sm:$0xff] %v405_v31 }
 0x22e   :  { %408 = vst [vmem:[#allocation7 + $0x8] sm:$0xff] %v406_v32 }
 0x22f   :  { %577 = shalt.err (!%p574_p6)
}
 0x230   :  { %s578_s10 = scalar_lea.hbm %s695_s6, 256 }
 0x231   :  { %p579_p7 = scmp.ne.s32.totalorder %s695_s6, %s578_s10  ;;  %p582_p8 = scmp.lt.u32.totalorder %s578_s10, %s695_s6 }
 0x233   :  { %p584_p9 = pnand %p582_p8, %p579_p7 }
 0x235   :  { %587 = shalt.err (!%p584_p9)
}
 0x236   :  { %418 = dma.vmem_to_hbm [thread:$0]  %s416_s7, 256, %s695_s6, [#allocation4]  }
 0x237   :  { %592 = dma.done.wait [#allocation4], 256  }
 0x238   :  { %593 = vsyncadd [#allocation4], 4294967040 }
 0x239   :  { %422 = vsyncpa [#allocation3], 1 }
 0x23a   :  { %423 = vsyncpa [#allocation6], 1 }
 0x23b   :  { %424 = vsyncpa [#allocation4], 1 }

</bundles_post_ra>
